<compile_context>
chip_gen: v7x
topology: tpu7x:2x2x1
jax: 0.10.0
libtpu: 0.0.40
codegen_flags: <defaults>
</compile_context>

<pallas_src>
import numpy as np
import jax
import jax.numpy as jnp
from jax.experimental import pallas as pl
from jax.experimental.pallas import tpu as pltpu


# ---------------------------------------------------------------------------
# Generation-aware VMEM budgeting (v5e/v6e: 128 MiB per core, v7x: 64 MiB)
# ---------------------------------------------------------------------------
def _vmem_capacity_bytes():
    try:
        cap = int(pltpu.get_tpu_info().vmem_capacity_bytes)
        if cap > 0:
            return cap
    except Exception:
        pass
    return 64 << 20          # conservative default: v7x per-TensorCore VMEM


def _vmem_limit(needed_bytes, cap_bytes):
    # Leave >= 16 MiB headroom under the physical per-core VMEM for Mosaic
    # internal scratch; do NOT clamp 128 MiB parts (v5e/v6e) down to 64 MiB.
    ceiling = max(16 << 20, int(cap_bytes) - (16 << 20))
    return int(min(ceiling, max(int(needed_bytes) + (4 << 20), 16 << 20)))


# ---------------------------------------------------------------------------
# Pallas kernel 1: packed gt-affinity mask (seg_to_affgraph kept in registers)
# ---------------------------------------------------------------------------
def _gtaff_pack_kernel(seg_ref, prev_ref, rmask_ref, out_ref):
    """One row-strip of the folded (N*H, W) label image.

    Output int32: bit0 = y-edge gt affinity, bit1 = x-edge gt affinity.
    """
    seg = seg_ref[...]                                   # (TS, W) int32 labels
    rolled_up = pltpu.roll(seg, shift=1, axis=0)         # seg[r-1, x] (wrap @ r=0)
    rloc = jax.lax.broadcasted_iota(jnp.int32, seg.shape, 0)
    col = jax.lax.broadcasted_iota(jnp.int32, seg.shape, 1)
    # strip-top halo: the row above this strip comes from the tiny prev input
    seg_up = jnp.where(rloc == 0, prev_ref[0:1, :], rolled_up)
    seg_left = pltpu.roll(seg, shift=1, axis=1)          # seg[r, x-1] (wrap @ x=0)
    fg = seg > 0
    # precomputed (global_row % H) >= 1 mask — also kills the roll wrap across
    # image boundaries inside the folded (N*H, W) layout (no per-vreg modulo).
    in_row = rmask_ref[...] != 0                         # (TS, 1), lane-broadcast
    gt0 = in_row & (seg == seg_up) & fg
    gt1 = (col >= 1) & (seg == seg_left) & fg
    out_ref[...] = gt0.astype(jnp.int32) + 2 * gt1.astype(jnp.int32)


def _pick_strip_rows(R, W, cap_bytes):
    """Rows per grid step for the prep kernel (multiple of 8, divides R)."""
    if R % 8 != 0:
        # Rare shapes (N*H not a multiple of 8): one full-array block.  The
        # block is only 2 int32 planes now, so this stays small in practice.
        # TODO(synk): clipped ragged strips would cover this with multi-step
        # pipelining for very large odd-sized images.
        return R
    bytes_per_row = 2 * 2 * W * 4 + 16      # double-buffered seg-in + packed-out
    budget = max(cap_bytes // 4, 4 << 20)
    rows_budget = max(8, (budget // bytes_per_row) // 8 * 8)
    # keep >= MIN_STEPS grid steps when the array allows it, so the
    # auto-pipeline has something to overlap and both v7x TCs get work.
    MIN_STEPS = 8
    rows_steps = max(8, ((R // MIN_STEPS) // 8) * 8)
    # mem-bound kernel: no benefit past a few MiB per block.
    rows_roofline = max(8, ((4 << 20) // (W * 4)) // 8 * 8)
    cap_rows = min(rows_budget, rows_steps, rows_roofline, R, 32768)
    ts = 8
    t = (cap_rows // 8) * 8
    while t >= 8:
        if R % t == 0:
            ts = t
            break
        t -= 8
    return ts


def malis_prep(groundtruth):
    """groundtruth (N, 1, H, W) int -> packed gt-affinity mask (N, H, W) int32."""
    groundtruth = jnp.asarray(groundtruth, jnp.int32)
    N, C1, H, W = groundtruth.shape
    assert C1 == 1
    seg2d = groundtruth[:, 0].reshape(N * H, W)          # fold batch into rows
    R = N * H

    cap = _vmem_capacity_bytes()
    TS = _pick_strip_rows(R, W, cap)
    num_strips = -(-R // TS)                             # exact by construction

    # Tiny side inputs: per-strip previous row (1-row halo) and the row mask.
    starts = np.arange(num_strips, dtype=np.int64) * TS
    prev_idx = np.maximum(starts - 1, 0)
    prev8 = jnp.repeat(
        jnp.take(seg2d, jnp.asarray(prev_idx, dtype=jnp.int32), axis=0), 8, axis=0)
    rmask = jnp.asarray(((np.arange(R) % H) >= 1).astype(np.int32).reshape(R, 1))

    seg_blk = pl.BlockSpec((TS, W), lambda i: (i, 0))
    prev_blk = pl.BlockSpec((8, W), lambda i: (i, 0))
    rmask_blk = pl.BlockSpec((TS, 1), lambda i: (i, 0))
    out_blk = pl.BlockSpec((TS, W), lambda i: (i, 0))

    # TODO(synk): for W % 128 != 0 the packed-mask stores are masked vst.msk;
    # a lane-dense transpose/pad would help but would add a full device copy.
    needed_db = 2 * (2 * TS * W * 4 + 8 * W * 4 + TS * 4)
    cost = pl.CostEstimate(flops=12 * R * W, transcendentals=0,
                           bytes_accessed=2 * R * W * 4)

    packed = pl.pallas_call(
        _gtaff_pack_kernel,
        out_shape=jax.ShapeDtypeStruct((R, W), jnp.int32),
        grid_spec=pltpu.PrefetchScalarGridSpec(
            num_scalar_prefetch=0,
            grid=(num_strips,),
            in_specs=[seg_blk, prev_blk, rmask_blk],
            out_specs=out_blk),
        compiler_params=pltpu.CompilerParams(
            dimension_semantics=("parallel",),
            vmem_limit_bytes=_vmem_limit(needed_db, cap)),
        cost_estimate=cost,
    )(seg2d, prev8, rmask)
    return packed.reshape(N, H, W)


# ---------------------------------------------------------------------------
# Pallas kernel 2: lane-dense blockwise partial sums of the gradient tensor
# ---------------------------------------------------------------------------
def _blocksum_kernel(g_ref, psum_ref):
    g = g_ref[...]                                       # (block_rows, 128)
    psum_ref[...] = jnp.sum(g.reshape(g.shape[0] // 8, 8, 128), axis=0)


def device_grads_and_loss(g_np, shape):
    """Single H2D of the host-combined gradients; Pallas partial-sum -> loss."""
    N, C, H, W = shape
    T = int(g_np.size)
    LANE = 128
    rows_needed = -(-T // LANE)

    cap = _vmem_capacity_bytes()
    budget = max(cap // 4, 4 << 20)
    rows_budget = max(8, (budget // (2 * LANE * 4)) // 8 * 8)
    MIN_BLOCKS = 8                                       # pipelining + 2 v7x TCs
    rows_steps = max(8, ((rows_needed // MIN_BLOCKS) // 8) * 8)
    block_rows = max(8, min(rows_budget, rows_steps, 4096))
    num_blocks = -(-rows_needed // block_rows)
    total_rows = num_blocks * block_rows
    T_pad = total_rows * LANE

    # pad/flatten on the HOST (no device-side jnp.pad copy); zeros sum to 0.
    flat = np.asarray(g_np, dtype=np.float32).reshape(-1)
    if T_pad != T:
        padded = np.zeros(T_pad, np.float32)
        padded[:T] = flat
        flat = padded
    g2d = jnp.asarray(flat.reshape(total_rows, LANE))    # the single H2D copy

    blk = pl.BlockSpec((block_rows, LANE), lambda i: (i, 0))
    psum_spec = pl.BlockSpec((8, LANE), lambda i: (i, 0))
    needed_db = 2 * (block_rows * LANE * 4 + 8 * LANE * 4)
    cost = pl.CostEstimate(flops=T_pad, transcendentals=0,
                           bytes_accessed=T_pad * 4 + num_blocks * 8 * LANE * 4)

    psum = pl.pallas_call(
        _blocksum_kernel,
        out_shape=jax.ShapeDtypeStruct((num_blocks * 8, LANE), jnp.float32),
        grid_spec=pltpu.PrefetchScalarGridSpec(
            num_scalar_prefetch=0,
            grid=(num_blocks,),
            in_specs=[blk],
            out_specs=psum_spec),
        compiler_params=pltpu.CompilerParams(
            dimension_semantics=("parallel",),
            vmem_limit_bytes=_vmem_limit(needed_db, cap)),
        cost_estimate=cost,
    )(g2d)
    loss = jnp.sum(psum)                                 # tiny XLA reduce

    grads_flat = g2d.reshape(-1)
    if T_pad != T:
        grads_flat = grads_flat[:T]   # device copy only when T isn't lane-aligned
    grads = grads_flat.reshape(N, C, H, W)
    return grads, loss


# ---------------------------------------------------------------------------
# Host-side MALIS loss weights (Kruskal MST + union-find with pair counting)
# ---------------------------------------------------------------------------
def _build_edges(H, W):
    node = np.arange(H * W, dtype=np.int64).reshape(H, W)
    # channel 0: (y, x) <-> (y-1, x) for y >= 1   (row-major order)
    yy0, xx0 = np.meshgrid(np.arange(1, H), np.arange(W), indexing='ij')
    e1_0 = node[yy0, xx0].ravel()
    e2_0 = node[yy0 - 1, xx0].ravel()
    c0 = np.zeros(e1_0.size, np.int64)
    # channel 1: (y, x) <-> (y, x-1) for x >= 1   (row-major order)
    yy1, xx1 = np.meshgrid(np.arange(H), np.arange(1, W), indexing='ij')
    e1_1 = node[yy1, xx1].ravel()
    e2_1 = node[yy1, xx1 - 1].ravel()
    c1 = np.ones(e1_1.size, np.int64)
    e1 = np.concatenate([e1_0, e1_1])
    e2 = np.concatenate([e2_0, e2_1])
    cc = np.concatenate([c0, c1])
    yy = np.concatenate([yy0.ravel(), yy1.ravel()])
    xx = np.concatenate([xx0.ravel(), xx1.ravel()])
    return e1, e2, cc, yy, xx


def _kruskal_pair_counts(seg_flat, node1, node2, weights, pos):
    n_nodes = seg_flat.size
    order = np.argsort(-weights, kind='stable')
    parent = np.arange(n_nodes)

    def find(x):
        root = x
        while parent[root] != root:
            root = parent[root]
        while parent[x] != root:
            parent[x], x = root, parent[x]
        return root

    counts = [dict() for _ in range(n_nodes)]
    for i in range(n_nodes):
        if seg_flat[i] != 0:
            counts[i][int(seg_flat[i])] = 1

    dloss = np.zeros(weights.shape, dtype=np.float32)
    for e in order:
        ra, rb = find(int(node1[e])), find(int(node2[e]))
        if ra == rb:
            continue
        ca, cb = counts[ra], counts[rb]
        if pos:
            npair = sum(n1 * cb.get(lbl, 0) for lbl, n1 in ca.items())
        else:
            tot_b = sum(cb.values())
            npair = sum(n1 * (tot_b - cb.get(lbl, 0)) for lbl, n1 in ca.items())
        dloss[e] = npair
        if len(ca) < len(cb):
            ra, rb, ca, cb = rb, ra, cb, ca
        parent[rb] = ra
        for lbl, n in cb.items():
            ca[lbl] = ca.get(lbl, 0) + n
        counts[rb] = {}
    return dloss


def _malis_weights_single(seg2d, aff3d, pos, edges):
    e1, e2, cc, yy, xx = edges
    # Host Kruskal sorts float64 copies of the float32 affinities (only affects
    # tie-breaking in the stable sort).
    w = aff3d[cc, yy, xx].astype(np.float64)
    dl = _kruskal_pair_counts(seg2d.reshape(-1).astype(np.int64), e1, e2, w, pos)
    out = np.zeros(aff3d.shape, np.float32)
    out[cc, yy, xx] = dl
    return out


# ---------------------------------------------------------------------------
# Module wrapper (Malis forward: constrained MALIS gradients -> sum)
# ---------------------------------------------------------------------------
class MalisPallas:
    """Constrained MALIS pseudo-loss; no learnable parameters (matches nn.Module)."""

    def __init__(self, constrained=True, malis_dim='auto'):
        assert constrained, "only the default constrained path is implemented"
        self._malis_dim = malis_dim
        self.loss_gradients = None

    def __call__(self, affinities, groundtruth):
        assert affinities.ndim == 4 and affinities.shape[1] == 2
        assert groundtruth.ndim == 4 and groundtruth.shape[1] == 1
        assert affinities.shape[0] == groundtruth.shape[0]
        assert affinities.shape[-2:] == groundtruth.shape[-2:]
        N, C, H, W = affinities.shape

        # Pallas: packed gt-affinity mask (seg_to_affgraph fused, 4 B/px D2H
        # instead of 16 B/px of constrained f32 planes).
        gt_dev = jnp.asarray(groundtruth, jnp.int32)
        packed = malis_prep(gt_dev)

        # Kick off all D2H transfers together so they overlap each other and
        # the prep kernel before the host MST starts.
        for a in (packed, affinities, gt_dev):
            if hasattr(a, "copy_to_host_async"):
                a.copy_to_host_async()

        aff_np = np.asarray(jax.device_get(affinities), dtype=np.float32)
        seg_np = np.asarray(jax.device_get(gt_dev))[:, 0]
        packed_np = np.asarray(jax.device_get(packed))

        # Bit-exact host reconstruction of the constrained affinities
        # (gt mask is {0,1}):  pos = min(aff, gt),  neg = max(aff, gt).
        gt_aff = np.empty((N, 2, H, W), np.float32)
        gt_aff[:, 0] = (packed_np & 1)
        gt_aff[:, 1] = ((packed_np >> 1) & 1)
        pos_aff = np.minimum(aff_np, gt_aff)
        neg_aff = np.maximum(aff_np, gt_aff)

        # TODO(synk): malis_loss_weights (Kruskal MST + union-find over
        # affinity-sorted edges) is a sequential, data-dependent graph
        # algorithm with no clean Pallas/TPU equivalent; it runs on the host.
        edges = _build_edges(H, W)
        pos_w = np.empty((N, C, H, W), np.float32)
        neg_w = np.empty((N, C, H, W), np.float32)
        for n in range(N):
            pos_w[n] = _malis_weights_single(seg_np[n], pos_aff[n], True, edges)
            neg_w[n] = _malis_weights_single(seg_np[n], neg_aff[n], False, edges)

        # Combine on the host (halves H2D), then a single H2D + Pallas
        # partial-sum kernel for the pseudo loss.
        g_np = (-(pos_w + neg_w) * np.float32(0.5)).astype(np.float32)
        grads, loss = device_grads_and_loss(g_np, (N, C, H, W))
        self.loss_gradients = grads
        return loss


# ---------------------------------------------------------------------------
def _seg_to_aff_reference(seg):
    H, W = seg.shape
    aff = np.zeros((2, H, W), np.float32)
    aff[0, 1:, :] = ((seg[1:, :] == seg[:-1, :]) & (seg[1:, :] > 0)).astype(np.float32)
    aff[1, :, 1:] = ((seg[:, 1:] == seg[:, :-1]) & (seg[:, 1:] > 0)).astype(np.float32)
    return aff


if __name__ == "__main__":
    N, C, H, W = 2, 2, 16, 16
    key = jax.random.PRNGKey(0)
    affinities = jax.random.uniform(key, (N, C, H, W), dtype=jnp.float32)

    # Deterministic blocky groundtruth labels with a background (label 0) cross.
    yy, xx = np.meshgrid(np.arange(H), np.arange(W), indexing='ij')
    labels = 1 + 2 * (yy >= H // 2) + (xx >= W // 2)
    labels = np.where((yy == H // 2) | (xx == W // 2), 0, labels).astype(np.int32)
    gt_np = np.stack([labels, np.roll(labels, 3, axis=1)])[:, None]   # (N,1,H,W)
    groundtruth = jnp.asarray(gt_np, jnp.int32)

    # sanity-check the Pallas prep kernel against a numpy reference
    packed = jax.block_until_ready(malis_prep(groundtruth))
    packed_np = np.asarray(packed)
    for n in range(N):
        ref = _seg_to_aff_reference(gt_np[n, 0])
        assert np.array_equal(packed_np[n] & 1, ref[0].astype(np.int32))
        assert np.array_equal((packed_np[n] >> 1) & 1, ref[1].astype(np.int32))

    malis = MalisPallas(constrained=True)
    pseudo_loss = jax.block_until_ready(malis(affinities, groundtruth))
    grads = jax.block_until_ready(malis.loss_gradients)
    assert grads.shape == (N, C, H, W)

    # the Pallas-reduced pseudo loss must equal the sum of the gradient tensor
    assert np.isclose(float(pseudo_loss), float(np.asarray(grads).sum()),
                      rtol=1e-5, atol=1e-5)

    print("KERNEL_OK")
</pallas_src>

<mosaic_0001>
module attributes {stable_mosaic.version = 11 : i64} {
  func.func @_gtaff_pack_kernel(%arg0: i32, %arg1: memref<8x16xi32, #tpu.memory_space<vmem>>, %arg2: memref<8x16xi32, #tpu.memory_space<vmem>>, %arg3: memref<8x1xi32, #tpu.memory_space<vmem>>, %arg4: memref<8x16xi32, #tpu.memory_space<vmem>>) attributes {dimension_semantics = [#tpu.dimension_semantics<parallel>], iteration_bounds = array<i64: 4>, scalar_prefetch = 0 : i64, scratch_operands = 0 : i64, tpu.core_type = #tpu.core_type<tc>, window_params = [{transform_indices = @transform_0, window_bounds = array<i64: 8, 16>}, {transform_indices = @transform_1, window_bounds = array<i64: 8, 16>}, {transform_indices = @transform_2, window_bounds = array<i64: 8, 1>}, {transform_indices = @transform_3, window_bounds = array<i64: 8, 16>}]} {
    %c0 = arith.constant 0 : index
    %c0_0 = arith.constant 0 : index
    %0 = vector.load %arg1[%c0, %c0_0] : memref<8x16xi32, #tpu.memory_space<vmem>>, vector<8x16xi32>
    %c1_i32 = arith.constant 1 : i32
    %1 = tpu.dynamic_rotate %0 by %c1_i32 dim 0 : vector<8x16xi32>, i32 -> vector<8x16xi32>
    %2 = tpu.iota {dimensions = array<i32: 0>} : vector<8x16xi32>
    %3 = tpu.iota {dimensions = array<i32: 1>} : vector<8x16xi32>
    %c0_i32 = arith.constant 0 : i32
    %4 = vector.broadcast %c0_i32 : i32 to vector<8x16xi32>
    %5 = arith.cmpi eq, %2, %4 : vector<8x16xi32>
    %c0_1 = arith.constant 0 : index
    %c0_2 = arith.constant 0 : index
    %6 = vector.load %arg2[%c0_1, %c0_2] : memref<8x16xi32, #tpu.memory_space<vmem>>, vector<1x16xi32>
    %7 = vector.shape_cast %6 : vector<1x16xi32> to vector<1x16xi32>
    %8 = vector.broadcast %7 : vector<1x16xi32> to vector<8x16xi32>
    %9 = arith.select %5, %8, %1 : vector<8x16xi1>, vector<8x16xi32>
    %c1_i32_3 = arith.constant 1 : i32
    %10 = tpu.dynamic_rotate %0 by %c1_i32_3 dim 1 : vector<8x16xi32>, i32 -> vector<8x16xi32>
    %c0_i32_4 = arith.constant 0 : i32
    %11 = vector.broadcast %c0_i32_4 : i32 to vector<8x16xi32>
    %12 = arith.cmpi sgt, %0, %11 : vector<8x16xi32>
    %c0_5 = arith.constant 0 : index
    %c0_6 = arith.constant 0 : index
    %13 = vector.load %arg3[%c0_5, %c0_6] : memref<8x1xi32, #tpu.memory_space<vmem>>, vector<8x1xi32>
    %c0_i32_7 = arith.constant 0 : i32
    %14 = vector.broadcast %c0_i32_7 : i32 to vector<8x1xi32>
    %15 = arith.cmpi ne, %13, %14 : vector<8x1xi32>
    %16 = arith.cmpi eq, %0, %9 : vector<8x16xi32>
    %17 = vector.broadcast %15 : vector<8x1xi1> to vector<8x16xi1>
    %18 = arith.andi %17, %16 : vector<8x16xi1>
    %19 = arith.andi %18, %12 : vector<8x16xi1>
    %c1_i32_8 = arith.constant 1 : i32
    %20 = vector.broadcast %c1_i32_8 : i32 to vector<8x16xi32>
    %21 = arith.cmpi sge, %3, %20 : vector<8x16xi32>
    %22 = arith.cmpi eq, %0, %10 : vector<8x16xi32>
    %23 = arith.andi %21, %22 : vector<8x16xi1>
    %24 = arith.andi %23, %12 : vector<8x16xi1>
    %25 = arith.extui %19 : vector<8x16xi1> to vector<8x16xi32>
    %26 = arith.extui %24 : vector<8x16xi1> to vector<8x16xi32>
    %c2_i32 = arith.constant 2 : i32
    %27 = vector.broadcast %c2_i32 : i32 to vector<8x16xi32>
    %28 = arith.muli %27, %26 : vector<8x16xi32>
    %29 = arith.addi %25, %28 : vector<8x16xi32>
    %c0_9 = arith.constant 0 : index
    %c0_10 = arith.constant 0 : index
    %30 = vector.load %arg4[%c0_9, %c0_10] : memref<8x16xi32, #tpu.memory_space<vmem>>, vector<8x16xi32>
    tpu.vector_store %arg4[%c0_9, %c0_10], %29 {strides = array<i32>} : memref<8x16xi32, #tpu.memory_space<vmem>>, vector<8x16xi32>,
    return
  }
  func.func @transform_0(%arg0: i32) -> (i32, i32) {
    %c0_i32 = arith.constant 0 : i32
    %c0_i32_0 = arith.constant 0 : i32
    return %arg0, %c0_i32 : i32, i32
  }
  func.func @transform_1(%arg0: i32) -> (i32, i32) {
    %c0_i32 = arith.constant 0 : i32
    %c0_i32_0 = arith.constant 0 : i32
    return %arg0, %c0_i32 : i32, i32
  }
  func.func @transform_2(%arg0: i32) -> (i32, i32) {
    %c0_i32 = arith.constant 0 : i32
    %c0_i32_0 = arith.constant 0 : i32
    return %arg0, %c0_i32 : i32, i32
  }
  func.func @transform_3(%arg0: i32) -> (i32, i32) {
    %c0_i32 = arith.constant 0 : i32
    %c0_i32_0 = arith.constant 0 : i32
    return %arg0, %c0_i32 : i32, i32
  }
}

</mosaic_0001>

<bundles_post_ra>
// kernel: tpu_custom_call.1
= control target key start
LH: loop header
LB: loop body
LE: loop exit
PB: predicated region body
PF: predicated region fallthrough
CT: control target
= control target key end

     0   :  { %s376_s12 = smov 0   ;;  %s405_s0 = inlined_call_operand.vmem [shape: s32[32,16], index: 0, kind: input, shape index: {}]   ;;  %s406_s1 = inlined_call_operand.vmem [shape: s32[32,16], index: 1, kind: input, shape index: {}]   ;;  %s407_s2 = inlined_call_operand.vmem [shape: s32[32,1], index: 2, kind: input, shape index: {}]   ;;  %s408_s3 = inlined_call_operand.vmem [shape: s32[32,16], index: 3, kind: output, shape index: {}]  }
   0x1 LB: > { %s320_s13 = sadd.s32 4294967295, %s351_s12   ;;  %p324_p0 = scmp.ge.s32.totalorder %s351_s12, 1  ;;  %s351_s12 = sphi %s376_s12, %s13_s12  }
   0x2   : > { %p154_p1 = scmp.lt.s32.totalorder %s351_s12, 5 }
   0x4   : > { %p155_p2 = pnand %p324_p0, %p154_p1 }
   0x5   : > { %p184_p3 = scmp.lt.s32.totalorder (!%p155_p2), %s320_s13, 3  ;;  %v353_v0 = vmov (!%p155_p2), 0   ;;  %s354_s21 = smov (!%p155_p2), 16   ;;  %vm213_vm1 = vcmask (!%p155_p2), 1047680   ;;  %v202_v8 = vlaneseq (!%p155_p2)  ;;  %vm241_vm12 = vcmask (!%p155_p2), 130048  }
   0x6   : > { %158 = sbr.rel (%p155_p2) target bundleno = 373 (0x175), region = 32  ;;  %343 = vset.pattern.permute.xlu1 (!%p155_p2), %v353_v0  ;;  %344 = vset.pattern.permute.xlu0 (!%p155_p2), %v353_v0  ;;  %s355_s22 = smov (!%p155_p2), 113  }
   0x7   : > { %v203_v9 = vshrl.u32 (!%p155_p2), %v202_v8, 7  ;;  %v205_v14 = vand.u32 (!%p155_p2), 127, %v202_v8 }
   0x9   : > { %vm206_vm2 = vcmp.eq.s32.totalorder (!%p155_p2), %v203_v9, 0  ;;  %vm231_vm7 = vcmp.ge.s32.totalorder (!%p155_p2), %v205_v14, 1 }
   0xd   : > { %s410_s13 = smov (!%p184_p3, %s320_s13), 3 }
   0xe   : > { %s384_s14 = sshll.u32 %s410_s13, 3 }
   0xf   : > { %s187_s17 = scalar_lea.vmem %s405_s0, %s384_s14  ;;  %s195_s20 = scalar_lea.vmem %s407_s2, %s384_s14 }
  0x10   : > { %v200_v1 = vld [vmem:[%s187_s17] sm:$0xff]  ;;  %s191_s25 = scalar_lea.vmem %s406_s1, %s384_s14  ;;  %s199_s28 = scalar_lea.vmem %s408_s3, %s384_s14 }
  0x11   : > { %v221_v2 = vld [vmem:[%s195_s20] sm:$0xff]  ;;  %214 = vrot.lane.b32.xlu0 %v200_v1, %s354_s21  ;;  %v201_v10 = vrot.slane %v200_v1, 7  ;;  %vm220_vm5 = vcmp.gt.s32.totalorder %v200_v1, 0 }
  0x12   : > { %vm222_vm0 = vcmp.ne.s32.totalorder %v221_v2, 0  ;;  %v329_v11 = vld [vmem:[%s191_s25] ss:$0 sm:$0xff] }
  0x13   : > { %v224_v3 = vsel %vm222_vm0, 1, %v353_v0  ;;  %v212_v13 = vsel %vm206_vm2, %v329_v11, %v201_v10 }
  0x14   : > { %226 = vperm.xlu1 %343, %v224_v3   ;;  %vm223_vm3 = vcmp.eq.s32.totalorder %v200_v1, %v212_v13 }
  0x83   : > { %v215_v4 = vpop.permute.xlu0 %214 }
  0x84   : > { %v216_v5 = vsel %vm213_vm1, %v215_v4, %v200_v1 }
  0x85   : > { %217 = vrot.lane.b32.xlu0 %v216_v5, %s354_s21 }
  0x93   : > { %v227_v12 = vpop.permute.xlu1 %226 }
  0x94   : > { %vm228_vm4 = vcmp.eq.s32.totalorder %v227_v12, 1 }
  0x95   : > { %vm229_vm6 = vmand %vm228_vm4, %vm223_vm3 }
  0x96   : > { %vm230_vm8 = vmand %vm229_vm6, %vm220_vm5 }
  0x97   : > { %v237_v18 = vsel %vm230_vm8, 1, %v353_v0 }
  0xf7   : > { %v218_v6 = vpop.permute.xlu0 %217 }
  0xf8   : > { %v219_v7 = vsel %vm213_vm1, %v218_v6, %v200_v1 }
  0xf9   : > { %232 = vrot.lane.b32.xlu1 %v219_v7, %s355_s22 }
 0x16b   : > { %v233_v15 = vpop.permute.xlu1 %232 }
 0x16c   : > { %vm234_vm9 = vcmp.eq.s32.totalorder %v200_v1, %v233_v15 }
 0x16d   : > { %vm235_vm10 = vmand %vm231_vm7, %vm234_vm9 }
 0x16e   : > { %vm236_vm11 = vmand %vm235_vm10, %vm220_vm5 }
 0x16f   : > { %v238_v16 = vsel %vm236_vm11, 1, %v353_v0 }
 0x170   : > { %v239_v17 = vmul.u32 2, %v238_v16 }
 0x172   : > { %v240_v19 = vadd.s32 %v239_v17, %v237_v18 }
 0x174   : > { %242 = vst.msk [vmem:[%s199_s28] sm:$0xff] %vm241_vm12, %v240_v19 }
 0x175 PF: > { %s13_s12 = sadd.s32 1, %s351_s12  }
 0x176   : > { %p10_p4 = scmp.ge.s32.totalorder %s13_s12, 6  }
 0x178   :  { %12 = sbr.rel (!%p10_p4) target bundleno = 1 (0x1), region = 68 }

</bundles_post_ra>
